<compile_context>
chip_gen: v6e
topology: v6e:2x2x1
jax: 0.10.0
libtpu: 0.0.40
codegen_flags: <defaults>
</compile_context>

<pallas_src>
import functools

import jax
import jax.numpy as jnp
from jax.experimental import pallas as pl
from jax.experimental.pallas import tpu as pltpu


# ---------------------------------------------------------------------------
# Tile-size / VMEM helpers
# ---------------------------------------------------------------------------
def _pick_tile(dim, target, align):
    """Largest tile <= target that divides `dim` and is a multiple of `align`;
    falls back to the full dim (always (8,128)-legal as a full block)."""
    if dim <= target:
        return dim
    t = (target // align) * align
    while t >= align:
        if dim % t == 0:
            return t
        t -= align
    return dim


def _tpu_vmem_capacity():
    try:
        return pltpu.get_tpu_info().vmem_capacity_bytes
    except Exception:
        return 64 * 1024 * 1024        # conservative (v7x per-core VMEM)


_VMEM_CAP = _tpu_vmem_capacity()
_VMEM_LIMIT = min((_VMEM_CAP * 3) // 4, 96 * 1024 * 1024)   # scoped-VMEM limit
_BLOCK_BUDGET = _VMEM_LIMIT // 2                            # for block sizing


def _pick_head_block(bh, n_q_tiles, tq, l_k, d, in_bytes, out_bytes,
                     budget_bytes, target=8):
    """(batch,head) pairs per attention grid step. Counts double-buffered
    pipeline blocks AND in-kernel f32 temporaries (scores / exp / attn), and
    keeps >= 2 grid steps so the pipeline double-buffers and the parallel axis
    can shard across TensorCores (v7x)."""
    min_steps = 2 if bh * n_q_tiles >= 2 else 1
    best = 1
    for hb in range(1, min(bh, target) + 1):
        if bh % hb:
            continue
        if (bh // hb) * n_q_tiles < min_steps:
            continue
        blocks = hb * (tq * d * in_bytes           # q
                       + 2 * l_k * d * in_bytes    # k, v
                       + tq * l_k * 4              # attn output (f32)
                       + tq * d * out_bytes)       # o output
        temps = 3 * hb * tq * l_k * 4              # scores, exp, attn (f32)
        if 2 * blocks + temps <= budget_bytes:
            best = hb
    return best


# ---------------------------------------------------------------------------
# Kernels
# ---------------------------------------------------------------------------
def _linear_kernel(x_ref, w_ref, b_ref, o_ref, acc_ref, *, compute_dtype):
    """K-tiled linear: o = x @ w + b, f32 VMEM accumulator, MXU fed in
    `compute_dtype` (bf16 on the fast path)."""
    @pl.when(pl.program_id(2) == 0)
    def _init():
        acc_ref[...] = jnp.zeros_like(acc_ref)

    acc_ref[...] += jnp.dot(x_ref[...].astype(compute_dtype),
                            w_ref[...].astype(compute_dtype),
                            preferred_element_type=jnp.float32)

    @pl.when(pl.program_id(2) == pl.num_programs(2) - 1)
    def _finalize():
        o_ref[...] = (acc_ref[...] + b_ref[...]).astype(o_ref.dtype)


def _attn_kernel(q_ref, k_ref, v_ref, attn_ref, o_ref, *, compute_dtype,
                 approx_recip):
    """Per grid step: `hb` independent (batch,head) problems for one query
    tile. 1/sqrt(head_dim) is already folded into Wq, so no scaling here."""
    q = q_ref[...].astype(compute_dtype)
    k = k_ref[...].astype(compute_dtype)
    v = v_ref[...].astype(compute_dtype)

    scores = jnp.einsum("hqd,hkd->hqk", q, k,
                        preferred_element_type=jnp.float32)

    m = jnp.max(scores, axis=-1, keepdims=True)
    e = jnp.exp(scores - m)
    denom = jnp.sum(e, axis=-1, keepdims=True)
    attn = e * pl.reciprocal(denom, approx=approx_recip)

    # TODO(synk): attention matrix kept f32 (module contract); could be bf16
    # to halve HBM writes for long L if the caller tolerates it.
    attn_ref[...] = attn.astype(attn_ref.dtype)
    o_ref[...] = jnp.einsum("hqk,hkd->hqd", attn.astype(compute_dtype), v,
                            preferred_element_type=jnp.float32
                            ).astype(o_ref.dtype)


def _out_proj_kernel(x_ref, w_ref, b_ref, o_ref, acc_ref, *, compute_dtype):
    """fc_o with merge-heads fused: head axis (last grid dim) is the reduction;
    lhs read in native (B, H, L, d) layout, weight rows sliced per head."""
    h = pl.program_id(3)

    @pl.when(h == 0)
    def _init():
        acc_ref[...] = jnp.zeros_like(acc_ref)

    acc_ref[...] += jnp.dot(x_ref[0, 0].astype(compute_dtype),
                            w_ref[...].astype(compute_dtype),
                            preferred_element_type=jnp.float32)

    @pl.when(h == pl.num_programs(3) - 1)
    def _finalize():
        o_ref[0] = (acc_ref[...] + b_ref[...]).astype(o_ref.dtype)


# ---------------------------------------------------------------------------
# Pallas wrappers
# ---------------------------------------------------------------------------
def pallas_linear(x, w, b, *, out_dtype, compute_dtype):
    """y = x @ w + b   x: (M, K), w: (K, N) [in,out layout], b: (N,)."""
    M, K = x.shape
    N = w.shape[1]
    tm = _pick_tile(M, 512, 8)
    tn = _pick_tile(N, 512, 128)
    tk = _pick_tile(K, 512, 128)
    grid = (M // tm, N // tn, K // tk)

    out_itemsize = jnp.dtype(out_dtype).itemsize
    cost = pl.CostEstimate(
        flops=int(2 * M * K * N),
        transcendentals=0,
        bytes_accessed=int(x.size * x.dtype.itemsize + w.size * w.dtype.itemsize
                           + b.size * b.dtype.itemsize + M * N * out_itemsize))

    return pl.pallas_call(
        functools.partial(_linear_kernel, compute_dtype=compute_dtype),
        out_shape=jax.ShapeDtypeStruct((M, N), out_dtype),
        grid=grid,
        in_specs=[
            pl.BlockSpec((tm, tk), lambda i, j, k: (i, k)),
            pl.BlockSpec((tk, tn), lambda i, j, k: (k, j)),
            pl.BlockSpec((1, tn), lambda i, j, k: (0, j)),
        ],
        out_specs=pl.BlockSpec((tm, tn), lambda i, j, k: (i, j)),
        scratch_shapes=[pltpu.VMEM((tm, tn), jnp.float32)],
        compiler_params=pltpu.CompilerParams(
            dimension_semantics=("parallel", "parallel", "arbitrary"),
            vmem_limit_bytes=_VMEM_LIMIT),
        cost_estimate=cost,
    )(x, w, b.reshape(1, N))


def pallas_attention(q, k, v, *, out_dtype, compute_dtype, approx_recip):
    """q: (BH, Lq, d), k/v: (BH, Lk, d) -> (attn (BH, Lq, Lk) f32, out)."""
    BH, Lq, d = q.shape
    Lk = k.shape[1]
    tq = _pick_tile(Lq, 256, 8)
    n_q_tiles = Lq // tq
    hb = _pick_head_block(BH, n_q_tiles, tq, Lk, d,
                          q.dtype.itemsize, jnp.dtype(out_dtype).itemsize,
                          _BLOCK_BUDGET)
    grid = (BH // hb, n_q_tiles)

    cost = pl.CostEstimate(
        flops=int(4 * BH * Lq * Lk * d + 6 * BH * Lq * Lk),
        transcendentals=int(BH * Lq * Lk),
        bytes_accessed=int(q.dtype.itemsize * (BH * Lq * d + 2 * BH * Lk * d)
                           + 4 * BH * Lq * Lk
                           + jnp.dtype(out_dtype).itemsize * BH * Lq * d))

    kernel = functools.partial(_attn_kernel, compute_dtype=compute_dtype,
                               approx_recip=approx_recip)
    attn, out = pl.pallas_call(
        kernel,
        out_shape=(
            jax.ShapeDtypeStruct((BH, Lq, Lk), jnp.float32),
            jax.ShapeDtypeStruct((BH, Lq, d), out_dtype),
        ),
        grid=grid,
        in_specs=[
            pl.BlockSpec((hb, tq, d), lambda i, qi: (i, qi, 0)),
            pl.BlockSpec((hb, Lk, d), lambda i, qi: (i, 0, 0)),
            pl.BlockSpec((hb, Lk, d), lambda i, qi: (i, 0, 0)),
        ],
        out_specs=(
            pl.BlockSpec((hb, tq, Lk), lambda i, qi: (i, qi, 0)),
            pl.BlockSpec((hb, tq, d), lambda i, qi: (i, qi, 0)),
        ),
        compiler_params=pltpu.CompilerParams(
            dimension_semantics=("parallel", "parallel"),
            vmem_limit_bytes=_VMEM_LIMIT),
        cost_estimate=cost,
    )(q, k, v)
    return attn, out


def pallas_out_projection(x4, w, b, *, out_dtype, compute_dtype):
    """fc_o fused with merge-heads. x4: (B, H, L, d), w: (H*d, N) in (in,out)
    head-major row layout, b: (N,). Returns (B, L, N)."""
    B, H, L, d = x4.shape
    N = w.shape[1]
    tm = _pick_tile(L, 512, 8)
    tn = _pick_tile(N, 512, 128)
    grid = (B, L // tm, N // tn, H)

    cost = pl.CostEstimate(
        flops=int(2 * B * L * H * d * N),
        transcendentals=0,
        bytes_accessed=int(x4.size * x4.dtype.itemsize + w.size * w.dtype.itemsize
                           + b.size * 4 + B * L * N * jnp.dtype(out_dtype).itemsize))

    return pl.pallas_call(
        functools.partial(_out_proj_kernel, compute_dtype=compute_dtype),
        out_shape=jax.ShapeDtypeStruct((B, L, N), out_dtype),
        grid=grid,
        in_specs=[
            pl.BlockSpec((1, 1, tm, d), lambda b_, i, j, h: (b_, h, i, 0)),
            pl.BlockSpec((d, tn), lambda b_, i, j, h: (h, j)),
            pl.BlockSpec((1, tn), lambda b_, i, j, h: (0, j)),
        ],
        out_specs=pl.BlockSpec((1, tm, tn), lambda b_, i, j, h: (b_, i, j)),
        scratch_shapes=[pltpu.VMEM((tm, tn), jnp.float32)],
        compiler_params=pltpu.CompilerParams(
            dimension_semantics=("parallel", "parallel", "parallel", "arbitrary"),
            vmem_limit_bytes=_VMEM_LIMIT),
        cost_estimate=cost,
    )(x4, w, b.reshape(1, N))


# ---------------------------------------------------------------------------
# MultiHeadAttentionLayer (forward only)
# ---------------------------------------------------------------------------
def init_params(key, hid_dim, n_heads):
    """PyTorch-Linear-style init. Kernel-ready (in,out)-layout weights are
    built once here (QKV pre-concatenated, 1/sqrt(head_dim) folded into Wq/bq)
    so no per-call transposes/stacks are needed."""
    ks = jax.random.split(key, 8)
    bound = 1.0 / (hid_dim ** 0.5)

    def lin(kw, kb):
        W = jax.random.uniform(kw, (hid_dim, hid_dim), jnp.float32, -bound, bound)
        b = jax.random.uniform(kb, (hid_dim,), jnp.float32, -bound, bound)
        return W, b                                  # PyTorch (out, in) layout

    Wq, bq = lin(ks[0], ks[1])
    Wk, bk = lin(ks[2], ks[3])
    Wv, bv = lin(ks[4], ks[5])
    Wo, bo = lin(ks[6], ks[7])

    head_dim = hid_dim // n_heads
    scale = 1.0 / (head_dim ** 0.5)
    wq_s, bq_s = Wq.T * scale, bq * scale            # scale folded into Q proj

    return {
        "w_q": wq_s, "b_q": bq_s,
        "w_k": Wk.T, "b_k": bk,
        "w_v": Wv.T, "b_v": bv,
        "w_o": Wo.T, "b_o": bo,
        "w_qkv": jnp.concatenate([wq_s, Wk.T, Wv.T], axis=1),
        "b_qkv": jnp.concatenate([bq_s, bk, bv]),
        "ref": {"fc_q": (Wq, bq), "fc_k": (Wk, bk),
                "fc_v": (Wv, bv), "fc_o": (Wo, bo)},
    }


def multi_head_attention(params, query, key, value, n_heads,
                         use_bf16=True, self_attention=None):
    B, Lq, hid_dim = query.shape
    Lk = key.shape[1]
    head_dim = hid_dim // n_heads
    cdt = jnp.bfloat16 if use_bf16 else jnp.float32   # MXU input dtype
    act_dt = jnp.bfloat16 if use_bf16 else jnp.float32  # intermediate activations

    if self_attention is None:
        self_attention = (query is key) and (key is value)

    if self_attention:
        # Fused QKV: one (B*L, hid) @ (hid, 3*hid) matmul — no activation
        # stacking, 3x larger N grid for pipelining / megacore sharding.
        qkv = pallas_linear(query.reshape(B * Lq, hid_dim),
                            params["w_qkv"], params["b_qkv"],
                            out_dtype=act_dt, compute_dtype=cdt)
        qkv = (qkv.reshape(B, Lq, 3, n_heads, head_dim)
                  .transpose(2, 0, 3, 1, 4))          # (3, B, H, L, d)
        Qh = qkv[0].reshape(B * n_heads, Lq, head_dim)
        Kh = qkv[1].reshape(B * n_heads, Lk, head_dim)
        Vh = qkv[2].reshape(B * n_heads, Lk, head_dim)
    else:
        # TODO(synk): when head_dim % 128 == 0 the split-heads transpose can be
        # folded into the attention BlockSpec as per-head lane slices.
        def project(x, L, w, b):
            y = pallas_linear(x.reshape(B * L, hid_dim), w, b,
                              out_dtype=act_dt, compute_dtype=cdt)
            return (y.reshape(B, L, n_heads, head_dim)
                     .transpose(0, 2, 1, 3)
                     .reshape(B * n_heads, L, head_dim))

        Qh = project(query, Lq, params["w_q"], params["b_q"])
        Kh = project(key, Lk, params["w_k"], params["b_k"])
        Vh = project(value, Lk, params["w_v"], params["b_v"])

    attn_flat, out_flat = pallas_attention(
        Qh, Kh, Vh, out_dtype=act_dt, compute_dtype=cdt, approx_recip=use_bf16)

    attention = attn_flat.reshape(B, n_heads, Lq, Lk)

    # Output projection with merge-heads fused into the kernel (head axis is a
    # reduction grid axis over the native (B, H, L, d) attention output).
    out4 = out_flat.reshape(B, n_heads, Lq, head_dim)
    if head_dim % 8 == 0:
        x = pallas_out_projection(out4, params["w_o"], params["b_o"],
                                  out_dtype=jnp.float32, compute_dtype=cdt)
    else:
        merged = out4.transpose(0, 2, 1, 3).reshape(B * Lq, hid_dim)
        x = pallas_linear(merged, params["w_o"], params["b_o"],
                          out_dtype=jnp.float32,
                          compute_dtype=cdt).reshape(B, Lq, hid_dim)
    return x, attention


# ---------------------------------------------------------------------------
# Reference (plain JAX) for a sanity check
# ---------------------------------------------------------------------------
def reference_mha(ref_params, query, key, value, n_heads):
    B, Lq, hid_dim = query.shape
    Lk = key.shape[1]
    head_dim = hid_dim // n_heads

    def lin(name, x):
        W, b = ref_params[name]
        return x @ W.T + b

    Q = lin("fc_q", query).reshape(B, Lq, n_heads, head_dim).transpose(0, 2, 1, 3)
    K = lin("fc_k", key).reshape(B, Lk, n_heads, head_dim).transpose(0, 2, 1, 3)
    V = lin("fc_v", value).reshape(B, Lk, n_heads, head_dim).transpose(0, 2, 1, 3)

    energy = jnp.einsum("bhqd,bhkd->bhqk", Q, K) / jnp.sqrt(jnp.float32(head_dim))
    attention = jax.nn.softmax(energy, axis=-1)
    x = jnp.einsum("bhqk,bhkd->bhqd", attention, V)
    x = x.transpose(0, 2, 1, 3).reshape(B, Lq, hid_dim)
    x = lin("fc_o", x)
    return x, attention


# ---------------------------------------------------------------------------
if __name__ == "__main__":
    B, L, hid_dim, n_heads = 2, 8, 32, 4

    root = jax.random.PRNGKey(0)
    kp, kq, kk, kv = jax.random.split(root, 4)
    params = init_params(kp, hid_dim, n_heads)

    query = jax.random.normal(kq, (B, L, hid_dim), jnp.float32)
    key = jax.random.normal(kk, (B, L, hid_dim), jnp.float32)
    value = jax.random.normal(kv, (B, L, hid_dim), jnp.float32)

    # --- exact-semantics check: f32 compute, distinct q/k/v (general path) ---
    x32, attn32 = multi_head_attention(params, query, key, value, n_heads,
                                       use_bf16=False)
    x32 = jax.block_until_ready(x32)
    attn32 = jax.block_until_ready(attn32)
    x_ref, attn_ref = reference_mha(params["ref"], query, key, value, n_heads)
    assert x32.shape == (B, L, hid_dim)
    assert attn32.shape == (B, n_heads, L, L)
    assert jnp.allclose(x32, x_ref, atol=1e-4, rtol=1e-4)
    assert jnp.allclose(attn32, attn_ref, atol=1e-4, rtol=1e-4)

    # --- fast path: bf16 MXU inputs + fused QKV (self-attention). bf16 matmul
    #     inputs (f32 accumulation) need a looser tolerance vs the f32 ref. ---
    xb, attnb = multi_head_attention(params, query, query, query, n_heads,
                                     use_bf16=True)
    xb = jax.block_until_ready(xb)
    attnb = jax.block_until_ready(attnb)
    x_ref2, attn_ref2 = reference_mha(params["ref"], query, query, query, n_heads)
    assert jnp.allclose(xb, x_ref2, atol=3e-2, rtol=3e-2)
    assert jnp.allclose(attnb, attn_ref2, atol=3e-2, rtol=3e-2)

    print("KERNEL_OK")
</pallas_src>

<mosaic_0001>
module attributes {stable_mosaic.version = 11 : i64} {
  func.func @_linear_kernel(%arg0: i32, %arg1: i32, %arg2: i32, %arg3: memref<16x32xf32, #tpu.memory_space<vmem>>, %arg4: memref<32x32xf32, #tpu.memory_space<vmem>>, %arg5: memref<1x32xf32, #tpu.memory_space<vmem>>, %arg6: memref<16x32xf32, #tpu.memory_space<vmem>>, %arg7: memref<16x32xf32, #tpu.memory_space<vmem>>) attributes {dimension_semantics = [#tpu.dimension_semantics<parallel>, #tpu.dimension_semantics<parallel>, #tpu.dimension_semantics<arbitrary>], iteration_bounds = array<i64: 1, 1, 1>, scalar_prefetch = 0 : i64, scratch_operands = 1 : i64, tpu.core_type = #tpu.core_type<tc>, window_params = [{transform_indices = @transform_0, window_bounds = array<i64: 16, 32>}, {transform_indices = @transform_1, window_bounds = array<i64: 32, 32>}, {transform_indices = @transform_2, window_bounds = array<i64: 1, 32>}, {transform_indices = @transform_3, window_bounds = array<i64: 16, 32>}]} {
    %c0_i32 = arith.constant 0 : i32
    %0 = arith.cmpi eq, %arg2, %c0_i32 : i32
    %1 = arith.extui %0 : i1 to i32
    %c0_i32_0 = arith.constant 0 : i32
    %2 = arith.cmpi ne, %1, %c0_i32_0 : i32
    scf.if %2 {
      %cst_10 = arith.constant 0.000000e+00 : f32
      %12 = vector.broadcast %cst_10 : f32 to vector<16x32xf32>
      %c0_11 = arith.constant 0 : index
      %c0_12 = arith.constant 0 : index
      %13 = vector.load %arg7[%c0_11, %c0_12] : memref<16x32xf32, #tpu.memory_space<vmem>>, vector<16x32xf32>
      tpu.vector_store %arg7[%c0_11, %c0_12], %12 {strides = array<i32>} : memref<16x32xf32, #tpu.memory_space<vmem>>, vector<16x32xf32>,
    } else {
    }
    %c0 = arith.constant 0 : index
    %c0_1 = arith.constant 0 : index
    %3 = vector.load %arg7[%c0, %c0_1] : memref<16x32xf32, #tpu.memory_space<vmem>>, vector<16x32xf32>
    %c0_2 = arith.constant 0 : index
    %c0_3 = arith.constant 0 : index
    %4 = vector.load %arg3[%c0_2, %c0_3] : memref<16x32xf32, #tpu.memory_space<vmem>>, vector<16x32xf32>
    %c0_4 = arith.constant 0 : index
    %c0_5 = arith.constant 0 : index
    %5 = vector.load %arg4[%c0_4, %c0_5] : memref<32x32xf32, #tpu.memory_space<vmem>>, vector<32x32xf32>
    %cst = arith.constant dense<0.000000e+00> : vector<16x32xf32>
    %6 = tpu.matmul %4, %5, %cst {dimension_numbers = #tpu.dot_dimension_numbers<[1], [0], [0], [1], [0, 0, 1, 1], [], []>} : vector<16x32xf32>, vector<32x32xf32>, vector<16x32xf32> -> vector<16x32xf32>
    %7 = arith.addf %3, %6 : vector<16x32xf32>
    %c0_6 = arith.constant 0 : index
    %c0_7 = arith.constant 0 : index
    %8 = vector.load %arg7[%c0_6, %c0_7] : memref<16x32xf32, #tpu.memory_space<vmem>>, vector<16x32xf32>
    tpu.vector_store %arg7[%c0_6, %c0_7], %7 {strides = array<i32>} : memref<16x32xf32, #tpu.memory_space<vmem>>, vector<16x32xf32>,
    %c0_i32_8 = arith.constant 0 : i32
    %9 = arith.cmpi eq, %arg2, %c0_i32_8 : i32
    %10 = arith.extui %9 : i1 to i32
    %c0_i32_9 = arith.constant 0 : i32
    %11 = arith.cmpi ne, %10, %c0_i32_9 : i32
    scf.if %11 {
      %c0_10 = arith.constant 0 : index
      %c0_11 = arith.constant 0 : index
      %12 = vector.load %arg7[%c0_10, %c0_11] : memref<16x32xf32, #tpu.memory_space<vmem>>, vector<16x32xf32>
      %c0_12 = arith.constant 0 : index
      %c0_13 = arith.constant 0 : index
      %13 = vector.load %arg5[%c0_12, %c0_13] : memref<1x32xf32, #tpu.memory_space<vmem>>, vector<1x32xf32>
      %14 = vector.broadcast %13 : vector<1x32xf32> to vector<16x32xf32>
      %15 = arith.addf %12, %14 : vector<16x32xf32>
      %c0_14 = arith.constant 0 : index
      %c0_15 = arith.constant 0 : index
      %16 = vector.load %arg6[%c0_14, %c0_15] : memref<16x32xf32, #tpu.memory_space<vmem>>, vector<16x32xf32>
      tpu.vector_store %arg6[%c0_14, %c0_15], %15 {strides = array<i32>} : memref<16x32xf32, #tpu.memory_space<vmem>>, vector<16x32xf32>,
    } else {
    }
    return
  }
  func.func @transform_0(%arg0: i32, %arg1: i32, %arg2: i32) -> (i32, i32) {
    %c0_i32 = arith.constant 0 : i32
    return %arg0, %arg2 : i32, i32
  }
  func.func @transform_1(%arg0: i32, %arg1: i32, %arg2: i32) -> (i32, i32) {
    %c0_i32 = arith.constant 0 : i32
    return %arg2, %arg1 : i32, i32
  }
  func.func @transform_2(%arg0: i32, %arg1: i32, %arg2: i32) -> (i32, i32) {
    %c0_i32 = arith.constant 0 : i32
    %c0_i32_0 = arith.constant 0 : i32
    return %c0_i32, %arg1 : i32, i32
  }
  func.func @transform_3(%arg0: i32, %arg1: i32, %arg2: i32) -> (i32, i32) {
    %c0_i32 = arith.constant 0 : i32
    return %arg0, %arg1 : i32, i32
  }
}

</mosaic_0001>

<bundles_post_ra>
// kernel: tpu_custom_call.1
= control target key start
LH: loop header
LB: loop body
LE: loop exit
PB: predicated region body
PF: predicated region fallthrough
CT: control target
= control target key end

     0   :  { %8 = vsyncpa [#allocation4], 0  ;;  %s325_s0 = inlined_call_operand.hbm [shape: f32[16,32], index: 0, kind: input, shape index: {}]   ;;  %s326_s1 = inlined_call_operand.hbm [shape: f32[32,32], index: 1, kind: input, shape index: {}]   ;;  %s327_s2 = inlined_call_operand.vmem [shape: f32[1,32], index: 2, kind: input, shape index: {}]   ;;  %s328_s3 = inlined_call_operand.hbm [shape: f32[16,32], index: 3, kind: output, shape index: {}]  }
   0x1   :  { %9 = vsyncpa [#allocation7], 0 }
   0x2   :  { %10 = vsyncpa [#allocation5], 0  ;;  %s270_s12 = smov [#allocation3]  }
   0x3   :  { %s16_s13 = sshll.u32 %s270_s12, 4  ;;  %s17_s13 = int_to_ptr.vmem [resolvable:$true] %s16_s13 }
   0x4   :  { %s212_s14 = scalar_lea.vmem %s17_s13, 256  ;;  %p217_p1 = scmp.lt.s32.totalorder %s17_s13, %s17_s13 }
   0x5   :  { %p213_p0 = scmp.ne.s32.totalorder %s17_s13, %s212_s14  ;;  %p218_p2 = scmp.lt.s32.totalorder %s212_s14, %s212_s14 }
   0x7   :  { %p219_p3 = por %p218_p2, %p217_p1 }
   0x9   :  { %p220_p4 = pnand %p219_p3, %p213_p0 }
   0xb   :  { %223 = shalt.err (!%p220_p4)
}
   0xc   :  { %s271_s15 = smov 128   ;;  %s272_s16 = smov 8  }
   0xd   :  { %22 = dma.hbm_to_vmem [thread:$0]  %s325_s0, 256, %s17_s13, [#allocation4], %s271_s15, %s271_s15, %s272_s16  }
   0xe   :  { %s273_s19 = smov [#allocation6]  }
   0xf   :  { %s28_s20 = sshll.u32 %s273_s19, 4  ;;  %s29_s20 = int_to_ptr.vmem [resolvable:$true] %s28_s20 }
  0x10   :  { %s232_s21 = scalar_lea.vmem %s29_s20, 512  ;;  %p237_p6 = scmp.lt.s32.totalorder %s29_s20, %s29_s20 }
  0x11   :  { %p233_p5 = scmp.ne.s32.totalorder %s29_s20, %s232_s21  ;;  %p238_p7 = scmp.lt.s32.totalorder %s232_s21, %s232_s21 }
  0x13   :  { %p239_p8 = por %p238_p7, %p237_p6 }
  0x15   :  { %p240_p9 = pnand %p239_p8, %p233_p5 }
  0x17   :  { %243 = shalt.err (!%p240_p9)
}
  0x18   :  { %34 = dma.hbm_to_vmem [thread:$0]  %s326_s1, 512, %s29_s20, [#allocation7], %s271_s15, %s271_s15, %s272_s16  }
  0x19   :  { %264 = dma.done.wait [#allocation4], 256  }
  0x1a   :  { %265 = vsyncadd [#allocation4], 4294967040 }
  0x1b   :  { %266 = dma.done.wait [#allocation7], 512  }
  0x1c   :  { %267 = vsyncadd [#allocation7], 4294966784  ;;  %vm47_vm0 = vcmask 261120   ;;  %v274_v0 = vmov 0.0   ;;  %v57_v1 = vld [vmem:[#allocation6 + $0x18] sm:$0xff]  ;;  %v56_v2 = vld [vmem:[#allocation6 + $0x10] sm:$0xff] }
  0x1d   :  { %49 = vst.msk [vmem:[#allocation2 + $0x8] sm:$0xff] %vm47_vm0, %v274_v0  ;;  %48 = vst.msk [vmem:[#allocation2] sm:$0xff] %vm47_vm0, %v274_v0  ;;  %187 = vmatprep.subr.mxu0 %v57_v1  ;;  %v52_v3 = vld [vmem:[#allocation3] sm:$0xff]  ;;  %v55_v4 = vld [vmem:[#allocation6 + $0x8] sm:$0xff]  ;;  %s275_s24 = smov [#allocation8]  }
  0x1e   :  { %188 = vmatpush3.msra.mxu0 %v57_v1  ;;  %195 = vmatprep.mubr.msk.f32.mxu0 %vm47_vm0, %v52_v3  ;;  %v54_v5 = vld [vmem:[#allocation6] sm:$0xff]  ;;  %v53_v6 = vld [vmem:[#allocation3 + $0x8] sm:$0xff]  ;;  %s165_s25 = sshll.u32 %s275_s24, 4  ;;  %s166_s25 = int_to_ptr.vmem [resolvable:$true] %s165_s25 }
  0x1f   :  { %189 = vmatprep.subr.mxu0 %v56_v2  ;;  %v180_v13 = vld [vmem:[%s327_s2] ss:$0 sm:$0xff]  ;;  %s244_s26 = scalar_lea.vmem %s166_s25, 256  ;;  %p249_p11 = scmp.lt.s32.totalorder %s166_s25, %s166_s25 }
  0x20   :  { %190 = vmatpush3.msra.mxu0 %v56_v2  ;;  %p245_p10 = scmp.ne.s32.totalorder %s166_s25, %s244_s26  ;;  %p250_p12 = scmp.lt.s32.totalorder %s244_s26, %s244_s26 }
  0x21   :  { %191 = vmatprep.subr.mxu0 %v55_v4 }
  0x22   :  { %192 = vmatpush3.msra.mxu0 %v55_v4  ;;  %p251_p13 = por %p250_p12, %p249_p11 }
  0x23   :  { %193 = vmatprep.subr.mxu0 %v54_v5 }
  0x24   :  { %194 = vmatpush3.msra.mxu0 %v54_v5  ;;  %v51_v7 = vld [vmem:[#allocation2 + $0x8] sm:$0xff]  ;;  %v50_v9 = vld [vmem:[#allocation2] sm:$0xff]  ;;  %p252_p0 = pnand %p251_p13, %p245_p10 }
  0x25   :  { %196 = vmatmul.mubr.msk.f32.vlgmr.msra.gmra.mxu0 %vm47_vm0, %v53_v6 }
  0xe5   :  { %v197_v8 = vpop.f32.mrf.mxu0 }
  0xe6   :  { %v141_v10 = vadd.f32 %v197_v8, %v51_v7 }
  0xe7   :  { %v131_v11 = vpop.f32.mrf.mxu0 }
  0xe8   :  { %143 = vst.msk [vmem:[#allocation2 + $0x8] sm:$0xff] %vm47_vm0, %v141_v10  ;;  %v140_v12 = vadd.f32 %v131_v11, %v50_v9 }
  0xea   :  { %142 = vst.msk [vmem:[#allocation2] sm:$0xff] %vm47_vm0, %v140_v12 }
  0xef   :  { %v148_v14 = vld [vmem:[#allocation2 + $0x8] sm:$0xff] }
  0xf0   :  { %v157_v15 = vadd.f32 %v180_v13, %v148_v14 }
  0xf1   :  { %v147_v16 = vld [vmem:[#allocation2] sm:$0xff] }
  0xf2   :  { %v156_v17 = vadd.f32 %v180_v13, %v147_v16  ;;  %159 = vst.msk [vmem:[#allocation8 + $0x8] sm:$0xff] %vm47_vm0, %v157_v15 }
  0xf4   :  { %158 = vst.msk [vmem:[#allocation8] sm:$0xff] %vm47_vm0, %v156_v17 }
  0xf5   :  { %255 = shalt.err (!%p252_p0)
}
  0xf6   :  { %171 = dma.vmem_to_hbm [thread:$0]  %s166_s25, 256, %s328_s3, [#allocation5], %s271_s15, %s271_s15, %s272_s16  }
  0xf7   :  { %268 = dma.done.wait [#allocation5], 256  }
  0xf8   :  { %269 = vsyncadd [#allocation5], 4294967040 }
  0xf9   :  { %175 = vsyncpa [#allocation4], 1 }
  0xfa   :  { %176 = vsyncpa [#allocation7], 1 }
  0xfb   :  { %177 = vsyncpa [#allocation5], 1 }

</bundles_post_ra>
